<compile_context>
chip_gen: v7x
topology: tpu7x:2x2x1
jax: 0.10.0
libtpu: 0.0.40
codegen_flags: <defaults>
</compile_context>

<pallas_src>
import functools

import jax
import jax.numpy as jnp
from jax.experimental import pallas as pl
from jax.experimental.pallas import tpu as pltpu


_TARGET_BLOCK_BYTES = 2 * 1024 * 1024  # ~2 MiB per block => ~8 MiB with dbl-buffered in+out


def _round_up(a: int, b: int) -> int:
    return (a + b - 1) // b * b


def _choose_layout(n: int, itemsize: int):
    """Pick (lane_width, rows_per_block, total_rows_after_padding) for one sample."""
    sub = max(8, 32 // itemsize)  # sublane packing: 8 (f32), 16 (bf16/f16), 32 (int8)

    # Lane width: prefer a large multiple of 128 that divides n (no padding needed).
    lane = 0
    for cand in (4096, 2048, 1024, 512, 256, 128):
        if n % cand == 0:
            lane = cand
            break
    if lane == 0:
        lane = min(1024, _round_up(n, 128))

    rows = -(-n // lane)  # ceil(n / lane)

    # Rows per block targeting ~_TARGET_BLOCK_BYTES, multiple of `sub`.
    target_rows = max(sub, (_TARGET_BLOCK_BYTES // (lane * itemsize)) // sub * sub)

    if rows <= sub:
        # Small sample: one (rows, lane) block; rows == full dim is a legal block dim.
        tr = rows
        rows_total = rows
    elif rows % sub == 0:
        # Largest divisor of `rows` that is a multiple of `sub` and <= target_rows.
        tr = sub
        d = sub
        limit = min(rows, target_rows)
        while d <= limit:
            if rows % d == 0:
                tr = d
            d += sub
        rows_total = rows
    else:
        tr = min(target_rows, _round_up(rows, sub))
        rows_total = _round_up(rows, tr)

    return lane, tr, rows_total


def _drop_path_kernel(scale_ref, x_ref, o_ref):
    # scale_ref: (B,) float32 in SMEM (scalar-prefetched), already mask / keep_prob.
    # x_ref / o_ref: (tr, lane) tile of one sample (batch dim squeezed).
    scale = scale_ref[pl.program_id(0)]              # f32 scalar from SMEM
    o_ref[...] = (x_ref[...] * scale).astype(o_ref.dtype)   # f32 math, cast at store


def drop_path(x, drop_prob: float = 0.0, training: bool = False, *, key=None):
    """Pallas implementation of timm-style drop_path (stochastic depth)."""
    if drop_prob == 0.0 or not training:
        return x
    assert key is not None, "need a PRNG key in training mode"

    keep_prob = 1.0 - drop_prob
    orig_shape = x.shape
    b = orig_shape[0]
    n = 1
    for d in orig_shape[1:]:
        n *= d

    itemsize = jnp.dtype(x.dtype).itemsize
    lane, tr, rows_total = _choose_layout(n, itemsize)
    n_pad = rows_total * lane

    x2d = x.reshape(b, n)
    if n_pad != n:
        x2d = jnp.pad(x2d, ((0, 0), (0, n_pad - n)))
    x3d = x2d.reshape(b, rows_total, lane)

    # Per-sample keep mask, computed and pre-scaled in float32 regardless of x.dtype.
    rand = jax.random.uniform(key, (b,), dtype=jnp.float32)
    mask = jnp.floor(jnp.float32(keep_prob) + rand)          # 0.0 or 1.0 per sample
    scale = mask / jnp.float32(keep_prob)                    # 0.0 or 1/keep_prob

    grid = (b, rows_total // tr)

    out3d = pl.pallas_call(
        _drop_path_kernel,
        out_shape=jax.ShapeDtypeStruct((b, rows_total, lane), x.dtype),
        grid_spec=pltpu.PrefetchScalarGridSpec(
            num_scalar_prefetch=1,                           # `scale` lands in SMEM
            grid=grid,
            in_specs=[
                # Batch dim squeezed (None) -> lane-dense, sublane-full (tr, lane) tiles.
                pl.BlockSpec((None, tr, lane), lambda i, r, s: (i, r, 0)),
            ],
            out_specs=pl.BlockSpec((None, tr, lane), lambda i, r, s: (i, r, 0)),
        ),
        compiler_params=pltpu.CompilerParams(
            dimension_semantics=("parallel", "parallel"),    # both axes megacore-shardable
        ),
    )(scale, x3d)

    out2d = out3d.reshape(b, n_pad)
    if n_pad != n:
        out2d = out2d[:, :n]
    return out2d.reshape(orig_shape)


class DropPath:
    """Mirror of the PyTorch DropPath module (forward only)."""

    def __init__(self, drop_prob=None):
        self.drop_prob = drop_prob if drop_prob is not None else 0.0
        self.training = True

    def __call__(self, x, *, key=None):
        return drop_path(x, self.drop_prob, self.training, key=key)


if __name__ == "__main__":
    key = jax.random.PRNGKey(0)
    k_x, k_mask, k_x2 = jax.random.split(key, 3)

    drop_prob = 0.25
    keep_prob = 1.0 - drop_prob

    # --- Test 1: f32 NCHW input, training mode (main kernel path) ---
    x = jax.random.normal(k_x, (2, 4, 16, 16), dtype=jnp.float32)
    module = DropPath(drop_prob=drop_prob)
    module.training = True
    out = jax.block_until_ready(module(x, key=k_mask))

    # Reference (torch-style math, same RNG draw shape as the wrapper: (B,)).
    rand = jax.random.uniform(k_mask, (x.shape[0],), dtype=jnp.float32)
    mask = jnp.floor(keep_prob + rand).reshape(x.shape[0], 1, 1, 1)
    ref = x / keep_prob * mask
    assert jnp.allclose(out, ref, atol=1e-6, rtol=1e-5), "f32 mismatch vs reference"

    # --- Test 2: bf16 input (f32 mask/scale math inside the kernel) ---
    xb = x.astype(jnp.bfloat16)
    outb = jax.block_until_ready(drop_path(xb, drop_prob, True, key=k_mask))
    refb = (xb.astype(jnp.float32) * (mask / keep_prob)).astype(jnp.bfloat16)
    assert jnp.allclose(outb.astype(jnp.float32), refb.astype(jnp.float32),
                        atol=1e-2, rtol=1e-2), "bf16 mismatch vs reference"

    # --- Test 3: N not a multiple of 128 (exercises the padding path) ---
    x2 = jax.random.normal(k_x2, (2, 3, 7, 5), dtype=jnp.float32)
    out2 = jax.block_until_ready(drop_path(x2, 0.5, True, key=k_mask))
    rand2 = jax.random.uniform(k_mask, (x2.shape[0],), dtype=jnp.float32)
    mask2 = jnp.floor(0.5 + rand2).reshape(x2.shape[0], 1, 1, 1)
    ref2 = x2 / 0.5 * mask2
    assert out2.shape == x2.shape
    assert jnp.allclose(out2, ref2, atol=1e-6, rtol=1e-5), "padded-path mismatch"

    # --- Test 4: eval mode / drop_prob == 0 -> identity ---
    module.training = False
    out_eval = jax.block_until_ready(module(x, key=k_mask))
    assert jnp.array_equal(out_eval, x), "eval path must be identity"

    print("KERNEL_OK")
</pallas_src>

<mosaic_0001>
module attributes {stable_mosaic.version = 11 : i64} {
  func.func @_drop_path_kernel(%arg0: i32, %arg1: i32, %arg2: memref<2xf32, #tpu.memory_space<smem>>, %arg3: memref<1x1x1024xf32, #tpu.memory_space<vmem>>, %arg4: memref<1x1x1024xf32, #tpu.memory_space<vmem>>) attributes {dimension_semantics = [#tpu.dimension_semantics<parallel>, #tpu.dimension_semantics<parallel>], iteration_bounds = array<i64: 2, 1>, scalar_prefetch = 1 : i64, scratch_operands = 0 : i64, tpu.core_type = #tpu.core_type<tc>, window_params = [{transform_indices = @transform_0, window_bounds = array<i64: 1, 1, 1024>}, {transform_indices = @transform_1, window_bounds = array<i64: 1, 1, 1024>}]} {
    %0 = arith.index_cast %arg0 : i32 to index
    %1 = memref.load %arg2[%0] : memref<2xf32, #tpu.memory_space<smem>>
    %c0 = arith.constant 0 : index
    %c0_0 = arith.constant 0 : index
    %c0_1 = arith.constant 0 : index
    %2 = vector.load %arg3[%c0, %c0_0, %c0_1] : memref<1x1x1024xf32, #tpu.memory_space<vmem>>, vector<1x1x1024xf32>
    %3 = vector.shape_cast %2 : vector<1x1x1024xf32> to vector<1x1024xf32>
    %4 = vector.broadcast %1 : f32 to vector<1x1024xf32>
    %5 = arith.mulf %3, %4 : vector<1x1024xf32>
    %c0_2 = arith.constant 0 : index
    %c0_3 = arith.constant 0 : index
    %c0_4 = arith.constant 0 : index
    %6 = vector.load %arg4[%c0_2, %c0_3, %c0_4] : memref<1x1x1024xf32, #tpu.memory_space<vmem>>, vector<1x1x1024xf32>
    %7 = vector.shape_cast %6 : vector<1x1x1024xf32> to vector<1x1024xf32>
    %8 = vector.shape_cast %5 : vector<1x1024xf32> to vector<1x1x1024xf32>
    tpu.vector_store %arg4[%c0_2, %c0_3, %c0_4], %8 {strides = array<i32>} : memref<1x1x1024xf32, #tpu.memory_space<vmem>>, vector<1x1x1024xf32>,
    return
  }
  func.func @transform_0(%arg0: i32, %arg1: i32, %arg2: memref<2xf32, #tpu.memory_space<smem>>) -> (i32, i32, i32) {
    %c0_i32 = arith.constant 0 : i32
    %c0_i32_0 = arith.constant 0 : i32
    return %arg0, %arg1, %c0_i32 : i32, i32, i32
  }
  func.func @transform_1(%arg0: i32, %arg1: i32, %arg2: memref<2xf32, #tpu.memory_space<smem>>) -> (i32, i32, i32) {
    %c0_i32 = arith.constant 0 : i32
    %c0_i32_0 = arith.constant 0 : i32
    return %arg0, %arg1, %c0_i32 : i32, i32, i32
  }
}

</mosaic_0001>

<bundles_post_ra>
// kernel: tpu_custom_call.1
= control target key start
LH: loop header
LB: loop body
LE: loop exit
PB: predicated region body
PF: predicated region fallthrough
CT: control target
= control target key end

     0   :  { %s671_s0 = inlined_call_operand.hbm [shape: f32[2], index: 0, kind: input, shape index: {}]   ;;  %s672_s1 = inlined_call_operand.hbm [shape: f32[2,1,1024], index: 1, kind: input, shape index: {}]   ;;  %s673_s2 = inlined_call_operand.hbm [shape: f32[2,1,1024], index: 2, kind: output, shape index: {}]  }
   0x1   :  { %s342_s11 = scalar_lea.hbm %s671_s0, 16 }
   0x2   :  { %p343_p0 = scmp.ne.s32.totalorder %s671_s0, %s342_s11  ;;  %p346_p1 = scmp.lt.u32.totalorder %s342_s11, %s671_s0 }
   0x4   :  { %p348_p2 = pnand %p346_p1, %p343_p0 }
   0x6   :  { %351 = shalt.err (!%p348_p2)  }
   0x7   :  { %s468_s16 = smov [#allocation3]  }
   0x8   :  { %8 = dma.hbm_to_smem %s671_s0, 16, %s468_s16, [#allocation2] }
   0x9   :  { %434 = dma.done.wait [#allocation2], 16 }
   0xa   :  { %435 = vsyncadd [#allocation2], 4294967280 }
   0xb   :  { %10 = sfence }
   0xc   :  { %11 = vsyncpa [#allocation5], 0 }
   0xd   :  { %13 = vsyncpa [#allocation5 + $0x1], 0 }
   0xe   :  { %14 = vsyncpa [#allocation6], 0 }
   0xf   :  { %16 = vsyncpa [#allocation6 + $0x1], 0  ;;  %s498_s19 = smov 0   ;;  %s500_s20 = smov 0  }
  0x10   :  { %s502_s21 = smov 0   ;;  %s504_s22 = smov 0  }
  0x11   :  { %s506_s23 = smov 0   ;;  %s508_s24 = smov 0  }
  0x12 LB: > { %s262_s0 = sadd.s32 4294967295, %s466_s24   ;;  %s263_s25 = sadd.s32 4294967294, %s466_s24   ;;  %s466_s24 = sphi %s508_s24, %s22_s24   ;;  %s462_s23 = sphi %s506_s23, %s689_s23   ;;  %s458_s22 = sphi %s504_s22, %s688_s22   ;;  %s454_s21 = sphi %s502_s21, %s687_s21   ;;  %s450_s20 = sphi %s500_s20, %s686_s20   ;;  %s446_s19 = sphi %s498_s19, %s685_s19  }
  0x13   : > { %s34_s26 = sadd.s32 1, %s462_s23  ;;  %s43_s27 = sadd.s32 1, %s454_s21 }
  0x14   : > { %p36_p3 = scmp.ge.s32.totalorder %s34_s26, 2  ;;  %p50_p4 = scmp.ne.s32.totalorder %s454_s21, %s450_s20 }
  0x15   : > { %p51_p5 = scmp.eq.s32.totalorder %s466_s24, 0  ;;  %p56_p6 = scmp.ne.s32.totalorder %s450_s20, %s446_s19 }
  0x16   : > { %s691_s26 = smov (%p36_p3, %s34_s26), 0  ;;  %p57_p8 = scmp.eq.s32.totalorder %s262_s0, 0 }
  0x17   : > { %p539_p7 = por %p51_p5, %p50_p4  ;;  %s38_s29 = ssub.s32 %s462_s23, %s691_s26 }
  0x18   : > { %p82_p9 = scmp.eq.s32.totalorder %s262_s0, 1  ;;  %p41_p10 = scmp.eq.s32.totalorder %s38_s29, 0 }
  0x19   : > { %p545_p11 = por %p57_p8, %p56_p6  ;;  %p88_p13 = scmp.eq.s32.totalorder %s263_s25, 1 }
  0x1a   : > { %p549_p12 = por %p82_p9, %p50_p4  ;;  %p291_p2 = scmp.lt.s32.totalorder %s466_s24, 2 }
  0x1b   : > { %s554_s4 = scalar_select %p41_p10, %s454_s21, %s43_s27  }
  0x1c   : > { %s677_s3 = scalar_select %p549_p12, 1, 0 }
  0x1d   : > { %p556_p0 = por %p88_p13, %p56_p6  ;;  %s108_s6 = sand.u32 1, %s454_s21  }
  0x1e   : > { %s266_s7 = sshll.u32 %s108_s6, 3  ;;  %s277_s8 = sshll.u32 %s462_s23, 7 }
  0x1f   : > { %s678_s5 = scalar_select %p556_p0, 1, 0 }
  0x20   : > { %s567_s11 = scalar_lea.hbm %s672_s1, %s277_s8  ;;  %s112_s12 = scalar_lea.vmem [#allocation4], %s266_s7 }
  0x21   : > { %s122_s13 = sshll.u32 %s112_s12, 4  ;;  %p573_p3 = pnand %p291_p2, %p539_p7  ;;  %s569_s13 = int_to_ptr.vmem [resolvable:$true] %s122_s13 }
  0x22   : > { %s109_s15 = scalar_lea.sflag [#allocation5], %s108_s6  ;;  %s352_s16 = scalar_lea.hbm %s567_s11, 128 }
  0x23   : > { %p353_p6 = scmp.ne.s32.totalorder %s567_s11, %s352_s16  ;;  %p354_p8 = pneg %p573_p3 }
  0x24   : > { %s357_s0 = scalar_lea.hbm %s672_s1, 256  ;;  %p358_p7 = scmp.lt.u32.totalorder %s567_s11, %s672_s1 }
  0x25   : > { %p355_p9 = pnand %p354_p8, %p353_p6  ;;  %p359_p13 = scmp.lt.u32.totalorder %s357_s0, %s352_s16 }
  0x26   : > { %p361_p1 = scmp.lt.u32.totalorder %s352_s16, %s567_s11 }
  0x27   : > { %p356_p10 = pneg %p355_p9  ;;  %p360_p2 = por %p359_p13, %p358_p7 }
  0x29   : > { %p362_p4 = por %p361_p1, %p360_p2 }
  0x2b   : > { %p363_p5 = pnand %p362_p4, %p356_p10 }
  0x2d   : > { %366 = shalt.err (!%p363_p5)
}
  0x2e   : > { %s367_s28 = scalar_lea.vmem %s569_s13, 128  ;;  %s469_s29 = smov [#allocation4]  }
  0x2f   : > { %p368_p6 = scmp.ne.s32.totalorder %s569_s13, %s367_s28  ;;  %s372_s6 = sshll.u32 %s469_s29, 4  ;;  %s373_s6 = int_to_ptr.vmem [resolvable:$false] %s372_s6 }
  0x30   : > { %s374_s7 = scalar_lea.vmem %s373_s6, 256  ;;  %p375_p12 = scmp.lt.s32.totalorder %s569_s13, %s373_s6 }
  0x31   : > { %p370_p9 = pnand %p368_p6, %p354_p8  ;;  %p376_p7 = scmp.lt.s32.totalorder %s374_s7, %s367_s28 }
  0x33   : > { %p371_p0 = pneg %p370_p9  ;;  %p377_p13 = por %p376_p7, %p375_p12 }
  0x35   : > { %p378_p1 = pnand %p377_p13, %p371_p0 }
  0x37   : > { %381 = shalt.err (!%p378_p1)
}
  0x38   : > { %286 = dma.hbm_to_vmem [thread:$0]  (!%p573_p3), %s567_s11, 128, %s569_s13, %s109_s15  }
  0x39   : > { %p680_p4 = scmp.lt.s32.totalorder %s466_s24, 3  ;;  %p681_p5 = scmp.ge.s32.totalorder %s466_s24, 1 }
  0x3b   : > { %p128_p8 = pnand %p681_p5, %p680_p4 }
  0x3c   : > { %s609_s8 = sand.u32 (!%p128_p8), 1, %s450_s20  }
  0x3d   : > { %131 = sbr.rel (%p128_p8) target bundleno = 95 (0x5f), region = 24  ;;  %s270_s9 = sshll.u32 (!%p128_p8), %s609_s8, 3 }
  0x3e   : > { %s134_s10 = scalar_lea.sflag (!%p128_p8), [#allocation5], %s609_s8  ;;  %s137_s12 = scalar_lea.vmem (!%p128_p8), [#allocation4], %s270_s9 }
  0x44   : > { %437 = dma.done.wait (%p545_p11), %s134_s10, 128  }
  0x45   : > { %439 = vsyncadd (%p545_p11), %s134_s10, 4294967168  ;;  %s156_s11 = sld [smem:[#allocation3 + %s458_s22]]  ;;  %s155_s13 = scalar_lea.vmem [#allocation7], %s270_s9  ;;  %v157_v0 = vld [vmem:[%s137_s12] sm:$0xff] }
  0x46   : > { %s178_s14 = sshll.u32 %s155_s13, 4  ;;  %s278_s15 = sshll.u32 %s458_s22, 7  ;;  %s619_s14 = int_to_ptr.vmem [resolvable:$true] %s178_s14 }
  0x47   : > { %s624_s30 = scalar_lea.hbm %s673_s2, %s278_s15  ;;  %s162_s18 = scalar_lea.sflag [#allocation6], %s609_s8 }
  0x48   : > { %s382_s0 = scalar_lea.vmem %s619_s14, 128  ;;  %p682_p12 = scmp.ne.s32.totalorder %s677_s3, 0 }
  0x49   : > { %p383_p11 = scmp.ne.s32.totalorder %s619_s14, %s382_s0  ;;  %s470_s22 = smov [#allocation7]  }
  0x4a   : > { %s386_s25 = sshll.u32 %s470_s22, 4  ;;  %s387_s25 = int_to_ptr.vmem [resolvable:$false] %s386_s25 }
  0x4b   : > { %v158_v1 = vstv %s156_s11  ;;  %p384_p0 = pnand %p383_p11, %p682_p12  ;;  %s388_s27 = scalar_lea.vmem %s387_s25, 256 }
  0x4c   : > { %v159_v2 = vmul.f32 %v158_v1, %v157_v0  ;;  %p389_p10 = scmp.lt.s32.totalorder %s619_s14, %s387_s25  ;;  %p390_p2 = scmp.lt.s32.totalorder %s388_s27, %s382_s0 }
  0x4d   : > { %p385_p3 = pneg %p384_p0 }
  0x4e   : > { %160 = vst [vmem:[%s155_s13] sm:$0xff] %v159_v2  ;;  %p391_p6 = por %p390_p2, %p389_p10 }
  0x50   : > { %p392_p9 = pnand %p391_p6, %p385_p3 }
  0x52   : > { %395 = shalt.err (!%p392_p9)
}
  0x53   : > { %s396_s28 = scalar_lea.hbm %s624_s30, 128  ;;  %s400_s7 = scalar_lea.hbm %s673_s2, 256 }
  0x54   : > { %p397_p7 = scmp.ne.s32.totalorder %s624_s30, %s396_s28  ;;  %p401_p4 = scmp.lt.u32.totalorder %s624_s30, %s673_s2 }
  0x55   : > { %p402_p5 = scmp.lt.u32.totalorder %s400_s7, %s396_s28  ;;  %p404_p11 = scmp.lt.u32.totalorder %s396_s28, %s624_s30 }
  0x56   : > { %p398_p13 = pnand %p397_p7, %p682_p12 }
  0x57   : > { %p403_p8 = por %p402_p5, %p401_p4 }
  0x58   : > { %p399_p1 = pneg %p398_p13 }
  0x59   : > { %p405_p0 = por %p404_p11, %p403_p8 }
  0x5b   : > { %p406_p3 = pnand %p405_p0, %p399_p1 }
  0x5d   : > { %409 = shalt.err (!%p406_p3)
}
  0x5e   : > { %281 = dma.vmem_to_hbm [thread:$0]  (%p682_p12), %s619_s14, 128, %s624_s30, %s162_s18  }
  0x5f PF: > { %s190_s10 = sand.u32 1, %s446_s19   ;;  %p683_p10 = scmp.ne.s32.totalorder %s678_s5, 0 }
  0x60   : > { %p684_p2 = scmp.ge.s32.totalorder %s466_s24, 2  ;;  %s191_s12 = scalar_lea.sflag [#allocation6], %s190_s10 }
  0x62   : > { %p288_p6 = pnand %p684_p2, %p683_p10 }
  0x64   : > { %441 = dma.done.wait (!%p288_p6), %s191_s12, 128  }
  0x65   : > { %443 = vsyncadd (!%p288_p6), %s191_s12, 4294967168  ;;  %s22_s24 = sadd.s32 1, %s466_s24   ;;  %s685_s19 = smov %s450_s20 }
  0x66   : > { %p19_p9 = scmp.ge.s32.totalorder %s22_s24, 4   ;;  %s686_s20 = smov %s454_s21 }
  0x67   : > { %s687_s21 = smov %s554_s4  ;;  %s688_s22 = smov %s462_s23 }
  0x68   : > { %s689_s23 = smov %s691_s26  ;;  %21 = sbr.rel (!%p19_p9) target bundleno = 18 (0x12), region = 69 }
  0x6f   :  { %196 = vsyncpa [#allocation5], 1 }
  0x70   :  { %198 = vsyncpa [#allocation5 + $0x1], 1 }
  0x71   :  { %199 = vsyncpa [#allocation6], 1 }
  0x72   :  { %201 = vsyncpa [#allocation6 + $0x1], 1 }

</bundles_post_ra>
